<compile_context>
chip_gen: v7x
topology: tpu7x:2x2x1
jax: 0.10.0
libtpu: 0.0.40
codegen_flags: <defaults>
</compile_context>

<pallas_src>
import functools
import math

import jax
import jax.numpy as jnp
import numpy as np
from jax.experimental import pallas as pl
from jax.experimental.pallas import tpu as pltpu


def _round_up(x, m):
    return ((x + m - 1) // m) * m


def _gcn_sage_disc_kernel(
    kp_ref,      # (TB, N*Din)    f32   batch tile, node-major flattened keypoints(+PE)
    w_in_ref,    # (N*Din, N*H)   bf16  kron(I_N, W_in)
    b_in_ref,    # (1, N*H)       f32   input bias tiled over nodes
    w1_ref,      # (L, N*H, N*H)  bf16  per-layer SAGE#1 Kron weight
    b1_ref,      # (L, 1, N*H)    f32
    w2_ref,      # (L, N*H, N*H)  bf16  per-layer SAGE#2 Kron weight
    b2_ref,      # (L, 1, N*H)    f32
    v_ref,       # (1, N*H)       f32   folded final-SAGE + header vector
    const_ref,   # (1, 1)         f32   folded header bias
    out_ref,     # (1, TB)        f32   lane-dense per-tile scores
    *,
    num_layers,
):
    # Input Linear folded as kron(I_N, W_in): single lane-dense matmul that
    # produces the (TB, N*H) activation slab directly (no reshapes in-kernel).
    x = (jnp.dot(kp_ref[...].astype(jnp.bfloat16), w_in_ref[...],
                 preferred_element_type=jnp.float32) + b_in_ref[...])

    # Residual SAGE blocks.  Each conv is ONE (TB, N*H)@(N*H, N*H) matmul with
    # W = kron(I_N, W_root) + kron(ones(N,N)/N, W_neigh) (exact for the
    # all-ones adjacency) — no node-means, no lane slices, no layout shuffles.
    def layer(l, x):
        h = (jnp.dot(x.astype(jnp.bfloat16), w1_ref[l],
                     preferred_element_type=jnp.float32) + b1_ref[l])
        h = jnp.maximum(h, 0.0)
        y = (jnp.dot(h.astype(jnp.bfloat16), w2_ref[l],
                     preferred_element_type=jnp.float32) + b2_ref[l] + x)
        return jnp.maximum(y, 0.0)

    # Short static unroll for small L (scheduler visibility); fori_loop with
    # dynamic layer indexing for larger L to bound live ranges / compile time.
    if num_layers <= 4:
        for l in range(num_layers):
            x = layer(l, x)
    else:
        x = jax.lax.fori_loop(0, num_layers, layer, x)

    # Final single-layer SAGE + header Linear(N*O -> 1), folded into a single
    # f32 mul + lane reduce:  score_b = <x_flat[b], v> + const.
    score = jnp.sum(x * v_ref[...], axis=1)                  # (TB,)
    out_ref[...] = score[None, :] + const_ref[...]


def _prepare_params(params, n):
    """Host-side prep: fold the all-ones graph + header into Kronecker weights."""
    H = params["wr1"].shape[-1]
    L = params["wr1"].shape[0]
    eye = jnp.eye(n, dtype=jnp.float32)
    mean_adj = jnp.full((n, n), 1.0 / n, dtype=jnp.float32)

    # Input Linear: block-diagonal kron(I_N, W_in); bias tiled over nodes.
    w_in = jnp.kron(eye, params["w_in"]).astype(jnp.bfloat16)        # (N*Din, N*H)
    b_in = jnp.tile(params["b_in"], (1, n))                          # (1, N*H)

    def sage_kron(wr, wl):
        # y[b, n*H+j] = sum_i x[b, n*H+i]*wr[i,j] + (1/N) sum_{m,i} x[b, m*H+i]*wl[i,j]
        return jnp.stack(
            [jnp.kron(eye, wr[l]) + jnp.kron(mean_adj, wl[l]) for l in range(L)]
        ).astype(jnp.bfloat16)                                       # (L, N*H, N*H)

    w1 = sage_kron(params["wr1"], params["wl1"])
    w2 = sage_kron(params["wr2"], params["wl2"])
    b1 = jnp.tile(params["b1"], (1, 1, n))                           # (L, 1, N*H)
    b2 = jnp.tile(params["b2"], (1, 1, n))

    # Fold final SAGE (wrf/wlf/bf) + header (hw/hb):
    #   score_b = sum_n <x[b,n], wrf @ hw[n]> + <mean_n x[b,n], wlf @ sum_n hw[n]>
    #             + <bf, sum_n hw[n]> + hb
    hw, wrf, wlf = params["hw"], params["wrf"], params["wlf"]
    hw_eff = hw @ wrf.T                                              # (N, H)
    hw_sum = jnp.sum(hw, axis=0)                                     # (O,)
    wl_eff = wlf @ hw_sum                                            # (H,)
    v = hw_eff.reshape(1, n * H) + jnp.tile(wl_eff[None, :], (1, n)) / n   # (1, N*H)
    const = (jnp.dot(params["bf"][0], hw_sum) + params["hb"][0, 0]).reshape(1, 1)
    return [w_in, b_in, w1, b1, w2, b2, v, const]


def gcn_sage_discriminator(kp, params, *, num_layers, tb=512):
    """kp: (B, N, Din) float32 -> (B, 1) float32."""
    B, N, Din = kp.shape
    H = params["wr1"].shape[-1]
    ND = N * Din

    # Clamp the batch tile for small batches (avoid padded-row wasted work),
    # keep it sublane-aligned.  tb up to ~1024 stays well within v7x VMEM.
    tb = min(_round_up(max(tb, 8), 8), _round_up(B, 8))
    num_tiles = pl.cdiv(B, tb)
    b_pad = num_tiles * tb
    if b_pad != B:
        kp = jnp.pad(kp, ((0, b_pad - B), (0, 0), (0, 0)))
    kp_flat = kp.reshape(b_pad, ND)                                  # node-major flatten

    weights = _prepare_params(params, N)
    kernel = functools.partial(_gcn_sage_disc_kernel, num_layers=num_layers)

    def full_spec(arr):
        nd = arr.ndim
        return pl.BlockSpec(arr.shape, lambda g, _nd=nd: (0,) * _nd)

    in_specs = [pl.BlockSpec((tb, ND), lambda g: (g, 0))] + [full_spec(a) for a in weights]

    out = pl.pallas_call(
        kernel,
        out_shape=jax.ShapeDtypeStruct((num_tiles, tb), jnp.float32),
        grid=(num_tiles,),
        in_specs=in_specs,
        out_specs=pl.BlockSpec((1, tb), lambda g: (g, 0)),
        compiler_params=pltpu.CompilerParams(dimension_semantics=("parallel",)),
    )(kp_flat, *weights)

    # lane-dense (num_tiles, TB) slab -> (B, 1)
    return out.reshape(-1)[:B][:, None]


def positional_encoding(B, J, C):
    """Matches GCNDiscriminator_base.cal_positional_encoding exactly."""
    i = jnp.arange(J, dtype=jnp.float32)[:, None]               # (J, 1)
    j = jnp.arange(C, dtype=jnp.float32)[None, :]               # (1, C)
    angle = i / jnp.power(10000.0, 2.0 * j / C)
    pe = jnp.where((jnp.arange(C)[None, :] % 2) == 0, jnp.sin(angle), jnp.cos(angle))
    return jnp.broadcast_to(pe[None], (B, J, C)).astype(jnp.float32)


def init_params(key, *, din, input_dim, hidden_dim, output_dim, num_nodes, num_layers):
    H, O, L, N = hidden_dim, output_dim, num_layers, num_nodes
    keys = jax.random.split(key, 13)

    def lin(k, fan_in, shape):
        bound = 1.0 / math.sqrt(fan_in)
        return jax.random.uniform(k, shape, jnp.float32, -bound, bound)

    return dict(
        w_in=lin(keys[0], din, (din, input_dim)),
        b_in=lin(keys[1], din, (1, input_dim)),
        wl1=lin(keys[2], H, (L, H, H)),
        wr1=lin(keys[3], H, (L, H, H)),
        b1=lin(keys[4], H, (L, 1, H)),
        wl2=lin(keys[5], H, (L, H, H)),
        wr2=lin(keys[6], H, (L, H, H)),
        b2=lin(keys[7], H, (L, 1, H)),
        wlf=lin(keys[8], H, (H, O)),
        wrf=lin(keys[9], H, (H, O)),
        bf=lin(keys[10], H, (1, O)),
        hw=lin(keys[11], O * N, (N, O)),   # header weight (1, N*O) reshaped to (N, O)
        hb=lin(keys[12], O * N, (1, 1)),
    )


def reference_forward(kp, params, num_layers):
    """Pure-JAX f32 reference of the module math (unfused, header as Linear)."""
    x = jnp.einsum("bnd,dh->bnh", kp, params["w_in"]) + params["b_in"]
    for l in range(num_layers):
        agg = jnp.mean(x, axis=1, keepdims=True)
        h = (jnp.einsum("bnh,hk->bnk", x, params["wr1"][l])
             + jnp.einsum("bnh,hk->bnk", agg, params["wl1"][l]) + params["b1"][l])
        h = jax.nn.relu(h)
        agg2 = jnp.mean(h, axis=1, keepdims=True)
        h2 = (jnp.einsum("bnh,hk->bnk", h, params["wr2"][l])
              + jnp.einsum("bnh,hk->bnk", agg2, params["wl2"][l]) + params["b2"][l])
        x = jax.nn.relu(h2 + x)
    agg = jnp.mean(x, axis=1, keepdims=True)
    xo = (jnp.einsum("bnh,ho->bno", x, params["wrf"])
          + jnp.einsum("bnh,ho->bno", agg, params["wlf"]) + params["bf"])
    return jnp.sum(xo * params["hw"][None], axis=(1, 2))[:, None] + params["hb"]


if __name__ == "__main__":
    # cfg consistent with the module (input_dim == hidden_dim so the first
    # residual SAGE block's shapes line up, as the PyTorch ctor assumes).
    cfg = dict(input_dim=32, hidden_dim=32, output_dim=32, disc_sup_dim=2,
               num_node=8, num_layers=2, use_self_loop=True, use_pe=True)
    B, N, C = 2, cfg["num_node"], cfg["disc_sup_dim"]

    key = jax.random.PRNGKey(0)
    k_kp, k_par = jax.random.split(key)
    keypoints = jax.random.normal(k_kp, (B, N, C), jnp.float32)

    # use_pe=True: concatenate positional encoding along the feature axis (glue).
    pe = positional_encoding(B, N, C)
    kp_in = jnp.concatenate([keypoints, pe], axis=-1)           # (B, N, 2*C)
    din = kp_in.shape[-1]

    params = init_params(
        k_par, din=din, input_dim=cfg["input_dim"], hidden_dim=cfg["hidden_dim"],
        output_dim=cfg["output_dim"], num_nodes=N, num_layers=cfg["num_layers"])

    out = gcn_sage_discriminator(kp_in, params, num_layers=cfg["num_layers"])
    out = jax.block_until_ready(out)

    # Loose tolerance: kernel uses bf16 MXU operands (f32 accumulate) while the
    # reference is pure f32.
    ref = reference_forward(kp_in, params, cfg["num_layers"])
    np.testing.assert_allclose(np.asarray(out), np.asarray(ref), rtol=5e-2, atol=1e-1)

    print("KERNEL_OK")
</pallas_src>

<mosaic_0001>
module attributes {stable_mosaic.version = 11 : i64} {
  func.func @_gcn_sage_disc_kernel(%arg0: i32, %arg1: memref<8x32xf32, #tpu.memory_space<vmem>>, %arg2: memref<32x256xbf16, #tpu.memory_space<vmem>>, %arg3: memref<1x256xf32, #tpu.memory_space<vmem>>, %arg4: memref<2x256x256xbf16, #tpu.memory_space<vmem>>, %arg5: memref<2x1x256xf32, #tpu.memory_space<vmem>>, %arg6: memref<2x256x256xbf16, #tpu.memory_space<vmem>>, %arg7: memref<2x1x256xf32, #tpu.memory_space<vmem>>, %arg8: memref<1x256xf32, #tpu.memory_space<vmem>>, %arg9: memref<1x1xf32, #tpu.memory_space<vmem>>, %arg10: memref<1x8xf32, #tpu.memory_space<vmem>>) attributes {dimension_semantics = [#tpu.dimension_semantics<parallel>], iteration_bounds = array<i64: 1>, scalar_prefetch = 0 : i64, scratch_operands = 0 : i64, tpu.core_type = #tpu.core_type<tc>, window_params = [{transform_indices = @transform_0, window_bounds = array<i64: 8, 32>}, {pipeline_mode = #tpu.pipeline_mode<synchronous>, transform_indices = @transform_1, window_bounds = array<i64: 32, 256>}, {pipeline_mode = #tpu.pipeline_mode<synchronous>, transform_indices = @transform_2, window_bounds = array<i64: 1, 256>}, {pipeline_mode = #tpu.pipeline_mode<synchronous>, transform_indices = @transform_3, window_bounds = array<i64: 2, 256, 256>}, {pipeline_mode = #tpu.pipeline_mode<synchronous>, transform_indices = @transform_4, window_bounds = array<i64: 2, 1, 256>}, {pipeline_mode = #tpu.pipeline_mode<synchronous>, transform_indices = @transform_5, window_bounds = array<i64: 2, 256, 256>}, {pipeline_mode = #tpu.pipeline_mode<synchronous>, transform_indices = @transform_6, window_bounds = array<i64: 2, 1, 256>}, {pipeline_mode = #tpu.pipeline_mode<synchronous>, transform_indices = @transform_7, window_bounds = array<i64: 1, 256>}, {pipeline_mode = #tpu.pipeline_mode<synchronous>, transform_indices = @transform_8, window_bounds = array<i64: 1, 1>}, {transform_indices = @transform_9, window_bounds = array<i64: 1, 8>}]} {
    %c0 = arith.constant 0 : index
    %c0_0 = arith.constant 0 : index
    %0 = vector.load %arg1[%c0, %c0_0] : memref<8x32xf32, #tpu.memory_space<vmem>>, vector<8x32xf32>
    %1 = arith.truncf %0 : vector<8x32xf32> to vector<8x32xbf16>
    %c0_1 = arith.constant 0 : index
    %c0_2 = arith.constant 0 : index
    %2 = vector.load %arg2[%c0_1, %c0_2] : memref<32x256xbf16, #tpu.memory_space<vmem>>, vector<32x256xbf16>
    %cst = arith.constant dense<0.000000e+00> : vector<8x256xf32>
    %3 = tpu.matmul %1, %2, %cst {dimension_numbers = #tpu.dot_dimension_numbers<[1], [0], [0], [1], [0, 0, 1, 1], [], []>} : vector<8x32xbf16>, vector<32x256xbf16>, vector<8x256xf32> -> vector<8x256xf32>
    %c0_3 = arith.constant 0 : index
    %c0_4 = arith.constant 0 : index
    %4 = vector.load %arg3[%c0_3, %c0_4] : memref<1x256xf32, #tpu.memory_space<vmem>>, vector<1x256xf32>
    %5 = vector.broadcast %4 : vector<1x256xf32> to vector<8x256xf32>
    %6 = arith.addf %3, %5 : vector<8x256xf32>
    %7 = arith.truncf %6 : vector<8x256xf32> to vector<8x256xbf16>
    %c0_5 = arith.constant 0 : index
    %c0_6 = arith.constant 0 : index
    %c0_7 = arith.constant 0 : index
    %8 = vector.load %arg4[%c0_5, %c0_6, %c0_7] : memref<2x256x256xbf16, #tpu.memory_space<vmem>>, vector<1x256x256xbf16>
    %9 = vector.shape_cast %8 : vector<1x256x256xbf16> to vector<256x256xbf16>
    %cst_8 = arith.constant dense<0.000000e+00> : vector<8x256xf32>
    %10 = tpu.matmul %7, %9, %cst_8 {dimension_numbers = #tpu.dot_dimension_numbers<[1], [0], [0], [1], [0, 0, 1, 1], [], []>} : vector<8x256xbf16>, vector<256x256xbf16>, vector<8x256xf32> -> vector<8x256xf32>
    %c0_9 = arith.constant 0 : index
    %c0_10 = arith.constant 0 : index
    %c0_11 = arith.constant 0 : index
    %11 = vector.load %arg5[%c0_9, %c0_10, %c0_11] : memref<2x1x256xf32, #tpu.memory_space<vmem>>, vector<1x1x256xf32>
    %12 = vector.shape_cast %11 : vector<1x1x256xf32> to vector<1x256xf32>
    %13 = vector.broadcast %12 : vector<1x256xf32> to vector<8x256xf32>
    %14 = arith.addf %10, %13 : vector<8x256xf32>
    %cst_12 = arith.constant 0.000000e+00 : f32
    %15 = vector.broadcast %cst_12 : f32 to vector<8x256xf32>
    %16 = arith.maximumf %14, %15 : vector<8x256xf32>
    %17 = arith.truncf %16 : vector<8x256xf32> to vector<8x256xbf16>
    %c0_13 = arith.constant 0 : index
    %c0_14 = arith.constant 0 : index
    %c0_15 = arith.constant 0 : index
    %18 = vector.load %arg6[%c0_13, %c0_14, %c0_15] : memref<2x256x256xbf16, #tpu.memory_space<vmem>>, vector<1x256x256xbf16>
    %19 = vector.shape_cast %18 : vector<1x256x256xbf16> to vector<256x256xbf16>
    %cst_16 = arith.constant dense<0.000000e+00> : vector<8x256xf32>
    %20 = tpu.matmul %17, %19, %cst_16 {dimension_numbers = #tpu.dot_dimension_numbers<[1], [0], [0], [1], [0, 0, 1, 1], [], []>} : vector<8x256xbf16>, vector<256x256xbf16>, vector<8x256xf32> -> vector<8x256xf32>
    %c0_17 = arith.constant 0 : index
    %c0_18 = arith.constant 0 : index
    %c0_19 = arith.constant 0 : index
    %21 = vector.load %arg7[%c0_17, %c0_18, %c0_19] : memref<2x1x256xf32, #tpu.memory_space<vmem>>, vector<1x1x256xf32>
    %22 = vector.shape_cast %21 : vector<1x1x256xf32> to vector<1x256xf32>
    %23 = vector.broadcast %22 : vector<1x256xf32> to vector<8x256xf32>
    %24 = arith.addf %20, %23 : vector<8x256xf32>
    %25 = arith.addf %24, %6 : vector<8x256xf32>
    %cst_20 = arith.constant 0.000000e+00 : f32
    %26 = vector.broadcast %cst_20 : f32 to vector<8x256xf32>
    %27 = arith.maximumf %25, %26 : vector<8x256xf32>
    %28 = arith.truncf %27 : vector<8x256xf32> to vector<8x256xbf16>
    %c1 = arith.constant 1 : index
    %c0_21 = arith.constant 0 : index
    %c0_22 = arith.constant 0 : index
    %29 = vector.load %arg4[%c1, %c0_21, %c0_22] : memref<2x256x256xbf16, #tpu.memory_space<vmem>>, vector<1x256x256xbf16>
    %30 = vector.shape_cast %29 : vector<1x256x256xbf16> to vector<256x256xbf16>
    %cst_23 = arith.constant dense<0.000000e+00> : vector<8x256xf32>
    %31 = tpu.matmul %28, %30, %cst_23 {dimension_numbers = #tpu.dot_dimension_numbers<[1], [0], [0], [1], [0, 0, 1, 1], [], []>} : vector<8x256xbf16>, vector<256x256xbf16>, vector<8x256xf32> -> vector<8x256xf32>
    %c1_24 = arith.constant 1 : index
    %c0_25 = arith.constant 0 : index
    %c0_26 = arith.constant 0 : index
    %32 = vector.load %arg5[%c1_24, %c0_25, %c0_26] : memref<2x1x256xf32, #tpu.memory_space<vmem>>, vector<1x1x256xf32>
    %33 = vector.shape_cast %32 : vector<1x1x256xf32> to vector<1x256xf32>
    %34 = vector.broadcast %33 : vector<1x256xf32> to vector<8x256xf32>
    %35 = arith.addf %31, %34 : vector<8x256xf32>
    %cst_27 = arith.constant 0.000000e+00 : f32
    %36 = vector.broadcast %cst_27 : f32 to vector<8x256xf32>
    %37 = arith.maximumf %35, %36 : vector<8x256xf32>
    %38 = arith.truncf %37 : vector<8x256xf32> to vector<8x256xbf16>
    %c1_28 = arith.constant 1 : index
    %c0_29 = arith.constant 0 : index
    %c0_30 = arith.constant 0 : index
    %39 = vector.load %arg6[%c1_28, %c0_29, %c0_30] : memref<2x256x256xbf16, #tpu.memory_space<vmem>>, vector<1x256x256xbf16>
    %40 = vector.shape_cast %39 : vector<1x256x256xbf16> to vector<256x256xbf16>
    %cst_31 = arith.constant dense<0.000000e+00> : vector<8x256xf32>
    %41 = tpu.matmul %38, %40, %cst_31 {dimension_numbers = #tpu.dot_dimension_numbers<[1], [0], [0], [1], [0, 0, 1, 1], [], []>} : vector<8x256xbf16>, vector<256x256xbf16>, vector<8x256xf32> -> vector<8x256xf32>
    %c1_32 = arith.constant 1 : index
    %c0_33 = arith.constant 0 : index
    %c0_34 = arith.constant 0 : index
    %42 = vector.load %arg7[%c1_32, %c0_33, %c0_34] : memref<2x1x256xf32, #tpu.memory_space<vmem>>, vector<1x1x256xf32>
    %43 = vector.shape_cast %42 : vector<1x1x256xf32> to vector<1x256xf32>
    %44 = vector.broadcast %43 : vector<1x256xf32> to vector<8x256xf32>
    %45 = arith.addf %41, %44 : vector<8x256xf32>
    %46 = arith.addf %45, %27 : vector<8x256xf32>
    %cst_35 = arith.constant 0.000000e+00 : f32
    %47 = vector.broadcast %cst_35 : f32 to vector<8x256xf32>
    %48 = arith.maximumf %46, %47 : vector<8x256xf32>
    %c0_36 = arith.constant 0 : index
    %c0_37 = arith.constant 0 : index
    %49 = vector.load %arg8[%c0_36, %c0_37] : memref<1x256xf32, #tpu.memory_space<vmem>>, vector<1x256xf32>
    %50 = vector.broadcast %49 : vector<1x256xf32> to vector<8x256xf32>
    %51 = arith.mulf %48, %50 : vector<8x256xf32>
    %cst_38 = arith.constant dense<0.000000e+00> : vector<8xf32>
    %52 = vector.multi_reduction <add>, %51, %cst_38 [1] : vector<8x256xf32> to vector<8xf32>
    %53 = vector.shape_cast %52 : vector<8xf32> to vector<1x8xf32>
    %c0_39 = arith.constant 0 : index
    %c0_40 = arith.constant 0 : index
    %54 = vector.load %arg9[%c0_39, %c0_40] : memref<1x1xf32, #tpu.memory_space<vmem>>, vector<1x1xf32>
    %55 = vector.broadcast %54 : vector<1x1xf32> to vector<1x8xf32>
    %56 = arith.addf %53, %55 : vector<1x8xf32>
    %c0_41 = arith.constant 0 : index
    %c0_42 = arith.constant 0 : index
    %57 = vector.load %arg10[%c0_41, %c0_42] : memref<1x8xf32, #tpu.memory_space<vmem>>, vector<1x8xf32>
    tpu.vector_store %arg10[%c0_41, %c0_42], %56 {strides = array<i32>} : memref<1x8xf32, #tpu.memory_space<vmem>>, vector<1x8xf32>,
    return
  }
  func.func @transform_0(%arg0: i32) -> (i32, i32) {
    %c0_i32 = arith.constant 0 : i32
    %c0_i32_0 = arith.constant 0 : i32
    return %arg0, %c0_i32 : i32, i32
  }
  func.func @transform_1(%arg0: i32) -> (i32, i32) {
    %c0_i32 = arith.constant 0 : i32
    %c0_i32_0 = arith.constant 0 : i32
    %c0_i32_1 = arith.constant 0 : i32
    return %c0_i32, %c0_i32_0 : i32, i32
  }
  func.func @transform_2(%arg0: i32) -> (i32, i32) {
    %c0_i32 = arith.constant 0 : i32
    %c0_i32_0 = arith.constant 0 : i32
    %c0_i32_1 = arith.constant 0 : i32
    return %c0_i32, %c0_i32_0 : i32, i32
  }
  func.func @transform_3(%arg0: i32) -> (i32, i32, i32) {
    %c0_i32 = arith.constant 0 : i32
    %c0_i32_0 = arith.constant 0 : i32
    %c0_i32_1 = arith.constant 0 : i32
    %c0_i32_2 = arith.constant 0 : i32
    return %c0_i32, %c0_i32_0, %c0_i32_1 : i32, i32, i32
  }
  func.func @transform_4(%arg0: i32) -> (i32, i32, i32) {
    %c0_i32 = arith.constant 0 : i32
    %c0_i32_0 = arith.constant 0 : i32
    %c0_i32_1 = arith.constant 0 : i32
    %c0_i32_2 = arith.constant 0 : i32
    return %c0_i32, %c0_i32_0, %c0_i32_1 : i32, i32, i32
  }
  func.func @transform_5(%arg0: i32) -> (i32, i32, i32) {
    %c0_i32 = arith.constant 0 : i32
    %c0_i32_0 = arith.constant 0 : i32
    %c0_i32_1 = arith.constant 0 : i32
    %c0_i32_2 = arith.constant 0 : i32
    return %c0_i32, %c0_i32_0, %c0_i32_1 : i32, i32, i32
  }
  func.func @transform_6(%arg0: i32) -> (i32, i32, i32) {
    %c0_i32 = arith.constant 0 : i32
    %c0_i32_0 = arith.constant 0 : i32
    %c0_i32_1 = arith.constant 0 : i32
    %c0_i32_2 = arith.constant 0 : i32
    return %c0_i32, %c0_i32_0, %c0_i32_1 : i32, i32, i32
  }
  func.func @transform_7(%arg0: i32) -> (i32, i32) {
    %c0_i32 = arith.constant 0 : i32
    %c0_i32_0 = arith.constant 0 : i32
    %c0_i32_1 = arith.constant 0 : i32
    return %c0_i32, %c0_i32_0 : i32, i32
  }
  func.func @transform_8(%arg0: i32) -> (i32, i32) {
    %c0_i32 = arith.constant 0 : i32
    %c0_i32_0 = arith.constant 0 : i32
    %c0_i32_1 = arith.constant 0 : i32
    return %c0_i32, %c0_i32_0 : i32, i32
  }
  func.func @transform_9(%arg0: i32) -> (i32, i32) {
    %c0_i32 = arith.constant 0 : i32
    %c0_i32_0 = arith.constant 0 : i32
    return %arg0, %c0_i32 : i32, i32
  }
}

</mosaic_0001>

<bundles_post_ra>
// kernel: tpu_custom_call.1
= control target key start
LH: loop header
LB: loop body
LE: loop exit
PB: predicated region body
PF: predicated region fallthrough
CT: control target
= control target key end

     0   :  { %s1873_s0 = inlined_call_operand.hbm [shape: f32[8,32], index: 0, kind: input, shape index: {}]   ;;  %s1874_s1 = inlined_call_operand.hbm [shape: bf16[32,256], index: 1, kind: input, shape index: {}]   ;;  %s1875_s2 = inlined_call_operand.vmem [shape: f32[1,256], index: 2, kind: input, shape index: {}]   ;;  %s1876_s3 = inlined_call_operand.hbm [shape: bf16[2,256,256], index: 3, kind: input, shape index: {}]   ;;  %s1877_s4 = inlined_call_operand.vmem [shape: f32[2,1,256], index: 4, kind: input, shape index: {}]   ;;  %s1878_s5 = inlined_call_operand.hbm [shape: bf16[2,256,256], index: 5, kind: input, shape index: {}]   ;;  %s1879_s6 = inlined_call_operand.vmem [shape: f32[2,1,256], index: 6, kind: input, shape index: {}]   ;;  %s1880_s7 = inlined_call_operand.vmem [shape: f32[1,256], index: 7, kind: input, shape index: {}]   ;;  %s1881_s8 = inlined_call_operand.<no memory space> [shape: f32[1,1], index: 8, kind: input, shape index: {}]   ;;  %s1882_s9 = inlined_call_operand.hbm [shape: f32[1,8], index: 9, kind: output, shape index: {}]  }
   0x1   :  { %v14_v0 = vstv %s1881_s8 }
   0x2   :  { %15 = vst [vmem:[#allocation2] sm:$0x1] %v14_v0 }
   0x3   :  { %16 = vsyncpa [#allocation4], 0 }
   0x4   :  { %17 = vsyncpa [#allocation7], 0 }
   0x5   :  { %18 = vsyncpa [#allocation10], 0 }
   0x6   :  { %19 = vsyncpa [#allocation5], 0  ;;  %s1691_s11 = smov [#allocation6]   ;;  %s1573_s15 = scalar_lea.hbm %s1874_s1, 512 }
   0x7   :  { %s35_s12 = sshll.u32 %s1691_s11, 4  ;;  %p1574_p0 = scmp.ne.s32.totalorder %s1874_s1, %s1573_s15  ;;  %s36_s12 = int_to_ptr.vmem [resolvable:$true] %s35_s12 }
   0x8   :  { %p1577_p1 = scmp.lt.u32.totalorder %s1573_s15, %s1874_s1 }
   0xa   :  { %p1579_p2 = pnand %p1577_p1, %p1574_p0 }
   0xc   :  { %1582 = shalt.err (!%p1579_p2)
}
   0xd   :  { %s1583_s8 = scalar_lea.vmem %s36_s12, 512  ;;  %p1588_p4 = scmp.lt.s32.totalorder %s36_s12, %s36_s12 }
   0xe   :  { %p1584_p3 = scmp.ne.s32.totalorder %s36_s12, %s1583_s8  ;;  %p1589_p5 = scmp.lt.s32.totalorder %s1583_s8, %s1583_s8 }
  0x10   :  { %p1590_p6 = por %p1589_p5, %p1588_p4 }
  0x12   :  { %p1591_p7 = pnand %p1590_p6, %p1584_p3 }
  0x14   :  { %1594 = shalt.err (!%p1591_p7)
}
  0x15   :  { %s1692_s20 = smov 128   ;;  %s1693_s21 = smov 8  }
  0x16   :  { %41 = dma.hbm_to_vmem [thread:$0]  %s1874_s1, 512, %s36_s12, [#allocation7], %s1692_s20, %s1692_s20, %s1693_s21  }
  0x17   :  { %s1694_s24 = smov [#allocation3]   ;;  %s1695_s26 = smov [#allocation8]  }
  0x18   :  { %s26_s25 = sshll.u32 %s1694_s24, 4  ;;  %s49_s27 = sshll.u32 %s1695_s26, 4  ;;  %s27_s25 = int_to_ptr.vmem [resolvable:$true] %s26_s25  ;;  %s50_s27 = int_to_ptr.vmem [resolvable:$true] %s49_s27 }
  0x19   :  { %s1595_s30 = scalar_lea.hbm %s1873_s0, 128 }
  0x1a   :  { %p1596_p8 = scmp.ne.s32.totalorder %s1873_s0, %s1595_s30  ;;  %p1599_p9 = scmp.lt.u32.totalorder %s1595_s30, %s1873_s0 }
  0x1c   :  { %p1601_p10 = pnand %p1599_p9, %p1596_p8 }
  0x1e   :  { %1604 = shalt.err (!%p1601_p10)
}
  0x1f   :  { %s1605_s1 = scalar_lea.vmem %s27_s25, 128  ;;  %p1610_p12 = scmp.lt.s32.totalorder %s27_s25, %s27_s25 }
  0x20   :  { %p1606_p11 = scmp.ne.s32.totalorder %s27_s25, %s1605_s1  ;;  %p1611_p13 = scmp.lt.s32.totalorder %s1605_s1, %s1605_s1 }
  0x22   :  { %p1612_p0 = por %p1611_p13, %p1610_p12 }
  0x24   :  { %p1613_p1 = pnand %p1612_p0, %p1606_p11 }
  0x26   :  { %1616 = shalt.err (!%p1613_p1)
}
  0x27   :  { %29 = dma.hbm_to_vmem [thread:$0]  %s1873_s0, 128, %s27_s25, [#allocation4]  }
  0x28   :  { %s1617_s18 = scalar_lea.hbm %s1876_s3, 8192 }
  0x29   :  { %p1618_p2 = scmp.ne.s32.totalorder %s1876_s3, %s1617_s18  ;;  %p1621_p3 = scmp.lt.u32.totalorder %s1617_s18, %s1876_s3 }
  0x2b   :  { %p1623_p4 = pnand %p1621_p3, %p1618_p2 }
  0x2d   :  { %1626 = shalt.err (!%p1623_p4)
}
  0x2e   :  { %s1627_s24 = scalar_lea.vmem %s50_s27, 8192  ;;  %p1632_p6 = scmp.lt.s32.totalorder %s50_s27, %s50_s27 }
  0x2f   :  { %p1628_p5 = scmp.ne.s32.totalorder %s50_s27, %s1627_s24  ;;  %p1633_p7 = scmp.lt.s32.totalorder %s1627_s24, %s1627_s24 }
  0x31   :  { %p1634_p8 = por %p1633_p7, %p1632_p6 }
  0x33   :  { %p1635_p9 = pnand %p1634_p8, %p1628_p5 }
  0x35   :  { %1638 = shalt.err (!%p1635_p9)
}
  0x36   :  { %55 = dma.hbm_to_vmem [thread:$0]  %s1876_s3, 8192, %s50_s27, [#allocation7], %s1692_s20, %s1692_s20, %s1693_s21  }
  0x37   :  { %s1696_s26 = smov [#allocation9]   ;;  %s1639_s10 = scalar_lea.hbm %s1878_s5, 8192 }
  0x38   :  { %s63_s28 = sshll.u32 %s1696_s26, 4  ;;  %p1640_p10 = scmp.ne.s32.totalorder %s1878_s5, %s1639_s10  ;;  %s64_s28 = int_to_ptr.vmem [resolvable:$true] %s63_s28 }
  0x39   :  { %p1643_p11 = scmp.lt.u32.totalorder %s1639_s10, %s1878_s5 }
  0x3b   :  { %p1645_p12 = pnand %p1643_p11, %p1640_p10 }
  0x3d   :  { %1648 = shalt.err (!%p1645_p12)
}
  0x3e   :  { %s1649_s12 = scalar_lea.vmem %s64_s28, 8192  ;;  %p1654_p0 = scmp.lt.s32.totalorder %s64_s28, %s64_s28 }
  0x3f   :  { %p1650_p13 = scmp.ne.s32.totalorder %s64_s28, %s1649_s12  ;;  %p1655_p1 = scmp.lt.s32.totalorder %s1649_s12, %s1649_s12 }
  0x41   :  { %p1656_p2 = por %p1655_p1, %p1654_p0 }
  0x43   :  { %p1657_p3 = pnand %p1656_p2, %p1650_p13 }
  0x45   :  { %1660 = shalt.err (!%p1657_p3)
}
  0x46   :  { %69 = dma.hbm_to_vmem [thread:$0]  %s1878_s5, 8192, %s64_s28, [#allocation10], %s1692_s20, %s1692_s20, %s1693_s21  }
  0x47   :  { %1683 = dma.done.wait [#allocation4], 128  }
  0x48   :  { %1684 = vsyncadd [#allocation4], 4294967168 }
  0x49   :  { %1685 = dma.done.wait [#allocation7], 8704  }
  0x4a   :  { %1686 = vsyncadd [#allocation7], 4294958592 }
  0x4b   :  { %1687 = dma.done.wait [#allocation10], 8192  }
  0x4c   :  { %1688 = vsyncadd [#allocation10], 4294959104  ;;  %v1697_v1 = vmov 0   ;;  %v1375_v2 = vld [vmem:[#allocation6 + $0x4] ss:$8 sps:$4 sm:$0xff]   ;;  %v89_v6 = vld [vmem:[#allocation3] sm:$0xff] }
  0x4d   :  { %163 = vmatprep.mubr.bf16.mxu0 %v1697_v1  ;;  %1374 = vset.pattern.permute.xlu0 %v1697_v1  ;;  %v1377_v3 = vld [vmem:[#allocation6] ss:$8 sps:$4 sm:$0xff]   ;;  %v1378_v4 = vld [vmem:[#allocation6 + $0x14] ss:$8 sps:$4 sm:$0xff]   ;;  %v1380_v5 = vld [vmem:[#allocation6 + $0x10] ss:$8 sps:$4 sm:$0xff]   ;;  %v90_v10 = vpack.c.bf16 %v89_v6, %v89_v6 }
  0x4e   :  { %131 = vmatprep.subr.bf16.mxu0 %v1375_v2  ;;  %v1381_v7 = vld [vmem:[#allocation8 + $0x4] ss:$8 sps:$4 sm:$0xff]   ;;  %v1383_v8 = vld [vmem:[#allocation8] ss:$8 sps:$4 sm:$0xff]   ;;  %v1384_v9 = vld [vmem:[#allocation8 + $0x14] ss:$8 sps:$4 sm:$0xff]  }
  0x4f   :  { %132 = vmatpush1.bf16.msra.mxu0 %v1377_v3  ;;  %378 = vmatprep.subr.bf16.mxu1 %v1381_v7  ;;  %v1386_v11 = vld [vmem:[#allocation8 + $0x10] ss:$8 sps:$4 sm:$0xff]   ;;  %vm127_vm0 = vcmask 261120   ;;  %v1387_v12 = vld [vmem:[#allocation8 + $0x24] ss:$8 sps:$4 sm:$0xff]   ;;  %vm1212_vm1 = vcmask 57344  }
  0x50   :  { %133 = vmatprep.subr.bf16.mxu0 %v1378_v4  ;;  %379 = vmatpush1.bf16.msra.mxu1 %v1383_v8  ;;  %v1389_v13 = vld [vmem:[#allocation8 + $0x20] ss:$8 sps:$4 sm:$0xff]   ;;  %v1390_v14 = vld [vmem:[#allocation8 + $0x34] ss:$8 sps:$4 sm:$0xff]   ;;  %v1392_v15 = vld [vmem:[#allocation8 + $0x30] ss:$8 sps:$4 sm:$0xff]   ;;  %v97_v4 = vlaneseq }
  0x51   :  { %380 = vmatprep.subr.bf16.mxu1 %v1384_v9  ;;  %v1393_v16 = vld [vmem:[#allocation8 + $0x44] ss:$8 sps:$4 sm:$0xff]   ;;  %v1395_v17 = vld [vmem:[#allocation8 + $0x40] ss:$8 sps:$4 sm:$0xff]   ;;  %v1396_v18 = vld [vmem:[#allocation8 + $0x54] ss:$8 sps:$4 sm:$0xff]  }
  0x52   :  { %v1398_v19 = vld [vmem:[#allocation8 + $0x50] ss:$8 sps:$4 sm:$0xff]   ;;  %v1399_v20 = vld [vmem:[#allocation8 + $0x64] ss:$8 sps:$4 sm:$0xff]   ;;  %v1401_v21 = vld [vmem:[#allocation8 + $0x60] ss:$8 sps:$4 sm:$0xff]  }
  0x53   :  { %134 = vmatpush1.bf16.msra.mxu0 %v1380_v5  ;;  %v1402_v22 = vld [vmem:[#allocation8 + $0x74] ss:$8 sps:$4 sm:$0xff]   ;;  %v1404_v23 = vld [vmem:[#allocation8 + $0x70] ss:$8 sps:$4 sm:$0xff]   ;;  %v1405_v24 = vld [vmem:[#allocation8 + $0x84] ss:$8 sps:$4 sm:$0xff]  }
  0x54   :  { %381 = vmatpush1.bf16.msra.mxu1 %v1386_v11  ;;  %v1407_v25 = vld [vmem:[#allocation8 + $0x80] ss:$8 sps:$4 sm:$0xff]   ;;  %v1408_v26 = vld [vmem:[#allocation8 + $0x94] ss:$8 sps:$4 sm:$0xff]   ;;  %v1410_v27 = vld [vmem:[#allocation8 + $0x90] ss:$8 sps:$4 sm:$0xff]  }
  0x55   :  { %382 = vmatprep.subr.bf16.mxu1 %v1387_v12  ;;  %v1411_v28 = vld [vmem:[#allocation8 + $0xa4] ss:$8 sps:$4 sm:$0xff]   ;;  %v1413_v29 = vld [vmem:[#allocation8 + $0xa0] ss:$8 sps:$4 sm:$0xff]   ;;  %v1414_v30 = vld [vmem:[#allocation8 + $0xb4] ss:$8 sps:$4 sm:$0xff]  }
  0x56   :  { %1235 = vmatmul.mubr.msk.bf16.vlgmr.msra.gmra.mrb[0].mxu0 %vm127_vm0, %v90_v10  ;;  %v1416_v31 = vld [vmem:[#allocation8 + $0xb0] ss:$8 sps:$4 sm:$0xff]   ;;  %v1417_v32 = vld [vmem:[#allocation8 + $0xc4] ss:$8 sps:$4 sm:$0xff]   ;;  %v1419_v33 = vld [vmem:[#allocation8 + $0xc0] ss:$8 sps:$4 sm:$0xff]  }
  0x57   :  { %v1420_v34 = vld [vmem:[#allocation8 + $0xd4] ss:$8 sps:$4 sm:$0xff]   ;;  %v1422_v35 = vld [vmem:[#allocation8 + $0xd0] ss:$8 sps:$4 sm:$0xff]   ;;  %v1423_v36 = vld [vmem:[#allocation8 + $0xe4] ss:$8 sps:$4 sm:$0xff]  }
  0x58   :  { %383 = vmatpush1.bf16.msra.mxu1 %v1389_v13  ;;  %v1425_v37 = vld [vmem:[#allocation8 + $0xe0] ss:$8 sps:$4 sm:$0xff]   ;;  %v1426_v38 = vld [vmem:[#allocation8 + $0xf4] ss:$8 sps:$4 sm:$0xff]   ;;  %v1428_v39 = vld [vmem:[#allocation8 + $0xf0] ss:$8 sps:$4 sm:$0xff]  }
  0x59   :  { %384 = vmatprep.subr.bf16.mxu1 %v1390_v14  ;;  %v1429_v40 = vld [vmem:[#allocation9] ss:$8 sps:$4 sm:$0xff]   ;;  %v1431_v41 = vld [vmem:[#allocation9 + $0x4] ss:$8 sps:$4 sm:$0xff]   ;;  %v1434_v42 = vld [vmem:[#allocation9 + $0x14] ss:$8 sps:$4 sm:$0xff]  }
  0x5a   :  { %627 = vmatprep.subr.bf16.mxu0 %v1431_v41  ;;  %v1432_v43 = vld [vmem:[#allocation9 + $0x10] ss:$8 sps:$4 sm:$0xff]   ;;  %v1437_v44 = vld [vmem:[#allocation9 + $0x24] ss:$8 sps:$4 sm:$0xff]   ;;  %v1435_v45 = vld [vmem:[#allocation9 + $0x20] ss:$8 sps:$4 sm:$0xff]  }
  0x5b   :  { %628 = vmatpush1.bf16.msra.mxu0 %v1429_v40  ;;  %v1440_v46 = vld [vmem:[#allocation9 + $0x34] ss:$8 sps:$4 sm:$0xff]   ;;  %v1438_v47 = vld [vmem:[#allocation9 + $0x30] ss:$8 sps:$4 sm:$0xff]   ;;  %v1443_v48 = vld [vmem:[#allocation9 + $0x44] ss:$8 sps:$4 sm:$0xff]  }
  0x5c   :  { %385 = vmatpush1.bf16.msra.mxu1 %v1392_v15  ;;  %629 = vmatprep.subr.bf16.mxu0 %v1434_v42  ;;  %v1441_v49 = vld [vmem:[#allocation9 + $0x40] ss:$8 sps:$4 sm:$0xff]   ;;  %v1446_v50 = vld [vmem:[#allocation9 + $0x54] ss:$8 sps:$4 sm:$0xff]   ;;  %v1444_v51 = vld [vmem:[#allocation9 + $0x50] ss:$8 sps:$4 sm:$0xff]  }
  0x5d   :  { %386 = vmatprep.subr.bf16.mxu1 %v1393_v16  ;;  %v1449_v52 = vld [vmem:[#allocation9 + $0x64] ss:$8 sps:$4 sm:$0xff]   ;;  %v1447_v53 = vld [vmem:[#allocation9 + $0x60] ss:$8 sps:$4 sm:$0xff]   ;;  %v1452_v54 = vld [vmem:[#allocation9 + $0x74] ss:$8 sps:$4 sm:$0xff]  }
  0x5e   :  { %v1450_v55 = vld [vmem:[#allocation9 + $0x70] ss:$8 sps:$4 sm:$0xff]   ;;  %v1455_v56 = vld [vmem:[#allocation9 + $0x84] ss:$8 sps:$4 sm:$0xff]   ;;  %v1453_v57 = vld [vmem:[#allocation9 + $0x80] ss:$8 sps:$4 sm:$0xff]  }
  0x5f   :  { %630 = vmatpush1.bf16.msra.mxu0 %v1432_v43  ;;  %v1458_v58 = vld [vmem:[#allocation9 + $0x94] ss:$8 sps:$4 sm:$0xff]   ;;  %v1456_v59 = vld [vmem:[#allocation9 + $0x90] ss:$8 sps:$4 sm:$0xff]   ;;  %v1461_v60 = vld [vmem:[#allocation9 + $0xa4] ss:$8 sps:$4 sm:$0xff]  }
  0x60   :  { %387 = vmatpush1.bf16.msra.mxu1 %v1395_v17  ;;  %631 = vmatprep.subr.bf16.mxu0 %v1437_v44  ;;  %v1459_v61 = vld [vmem:[#allocation9 + $0xa0] ss:$8 sps:$4 sm:$0xff]   ;;  %v1464_v62 = vld [vmem:[#allocation9 + $0xb4] ss:$8 sps:$4 sm:$0xff]   ;;  %v1462_v63 = vld [vmem:[#allocation9 + $0xb0] ss:$8 sps:$4 sm:$0xff]  }
  0x61   :  { %388 = vmatprep.subr.bf16.mxu1 %v1396_v18  ;;  %v1467_v0 = vld [vmem:[#allocation9 + $0xc4] ss:$8 sps:$4 sm:$0xff]   ;;  %v1465_v1 = vld [vmem:[#allocation9 + $0xc0] ss:$8 sps:$4 sm:$0xff]   ;;  %v1470_v2 = vld [vmem:[#allocation9 + $0xd4] ss:$8 sps:$4 sm:$0xff]  }
  0x62   :  { %v1468_v3 = vld [vmem:[#allocation9 + $0xd0] ss:$8 sps:$4 sm:$0xff]   ;;  %v1810_v5 = vshrl.u32 %v97_v4, 7  ;;  %v1501_v40 = vld [vmem:[#allocation8 + $0x180] ss:$8 sps:$4 sm:$0xff]  }
  0x63   :  { %632 = vmatpush1.bf16.msra.mxu0 %v1435_v45  ;;  %v95_v7 = vld [vmem:[%s1875_s2] sm:$0x3]  ;;  %v1509_v43 = vld [vmem:[#allocation8 + $0x1a4] ss:$8 sps:$4 sm:$0xff]   ;;  %v1507_v44 = vld [vmem:[#allocation8 + $0x1a0] ss:$8 sps:$4 sm:$0xff]  }
  0x64   :  { %389 = vmatpush1.bf16.msra.mxu1 %v1398_v19  ;;  %633 = vmatprep.subr.bf16.mxu0 %v1440_v46  ;;  %v1813_v6 = vsub.s32 0, %v1810_v5  ;;  %v1819_v8 = vsub.s32 1, %v1810_v5  ;;  %v1473_v19 = vld [vmem:[#allocation9 + $0xe4] ss:$8 sps:$4 sm:$0xff]   ;;  %v1506_v41 = vld [vmem:[#allocation8 + $0x194] ss:$8 sps:$4 sm:$0xff]  }
  0x65   :  { %390 = vmatprep.subr.bf16.mxu1 %v1399_v20  ;;  %v1471_v20 = vld [vmem:[#allocation9 + $0xe0] ss:$8 sps:$4 sm:$0xff]   ;;  %v1504_v42 = vld [vmem:[#allocation8 + $0x190] ss:$8 sps:$4 sm:$0xff]   ;;  %v1512_v45 = vld [vmem:[#allocation8 + $0x1b4] ss:$8 sps:$4 sm:$0xff]  }
  0x66   :  { %v100_v9 = vrot.slane %v95_v7, %v1813_v6  ;;  %v104_v10 = vrot.slane %v95_v7, %v1819_v8  ;;  %v1510_v46 = vld [vmem:[#allocation8 + $0x1b0] ss:$8 sps:$4 sm:$0xff]   ;;  %v1525_v7 = vld [vmem:[#allocation9 + $0x100] ss:$8 sps:$4 sm:$0xff]  }
  0x67   :  { %634 = vmatpush1.bf16.msra.mxu0 %v1438_v47  ;;  %v1515_v47 = vld [vmem:[#allocation8 + $0x1c4] ss:$8 sps:$4 sm:$0xff]  }
  0x68   :  { %391 = vmatpush1.bf16.msra.mxu1 %v1401_v21  ;;  %635 = vmatprep.subr.bf16.mxu0 %v1443_v48  ;;  %v1476_v21 = vld [vmem:[#allocation9 + $0xf4] ss:$8 sps:$4 sm:$0xff]   ;;  %v1513_v48 = vld [vmem:[#allocation8 + $0x1c0] ss:$8 sps:$4 sm:$0xff]  }
  0x69   :  { %392 = vmatprep.subr.bf16.mxu1 %v1402_v22  ;;  %v1474_v22 = vld [vmem:[#allocation9 + $0xf0] ss:$8 sps:$4 sm:$0xff]  }
  0x6b   :  { %636 = vmatpush1.bf16.msra.mxu0 %v1441_v49  ;;  %v1518_v49 = vld [vmem:[#allocation8 + $0x1d4] ss:$8 sps:$4 sm:$0xff]  }
  0x6c   :  { %393 = vmatpush1.bf16.msra.mxu1 %v1404_v23  ;;  %637 = vmatprep.subr.bf16.mxu0 %v1446_v50  ;;  %v1477_v23 = vld [vmem:[#allocation8 + $0x100] ss:$8 sps:$4 sm:$0xff]   ;;  %v1516_v50 = vld [vmem:[#allocation8 + $0x1d0] ss:$8 sps:$4 sm:$0xff]  }
  0x6d   :  { %394 = vmatprep.subr.bf16.mxu1 %v1405_v24  ;;  %v1479_v24 = vld [vmem:[#allocation8 + $0x104] ss:$8 sps:$4 sm:$0xff]  }
  0x6f   :  { %638 = vmatpush1.bf16.msra.mxu0 %v1444_v51  ;;  %v206_v51 = vld [vmem:[%s1877_s4] sm:$0x3] }
  0x70   :  { %395 = vmatpush1.bf16.msra.mxu1 %v1407_v25  ;;  %639 = vmatprep.subr.bf16.mxu0 %v1449_v52  ;;  %v1482_v25 = vld [vmem:[#allocation8 + $0x114] ss:$8 sps:$4 sm:$0xff]   ;;  %v211_v52 = vrot.slane %v206_v51, %v1813_v6 }
  0x71   :  { %396 = vmatprep.subr.bf16.mxu1 %v1408_v26  ;;  %v1480_v26 = vld [vmem:[#allocation8 + $0x110] ss:$8 sps:$4 sm:$0xff]  }
  0x73   :  { %640 = vmatpush1.bf16.msra.mxu0 %v1447_v53  ;;  %v215_v53 = vrot.slane %v206_v51, %v1819_v8 }
  0x74   :  { %397 = vmatpush1.bf16.msra.mxu1 %v1410_v27  ;;  %641 = vmatprep.subr.bf16.mxu0 %v1452_v54  ;;  %v1485_v27 = vld [vmem:[#allocation8 + $0x124] ss:$8 sps:$4 sm:$0xff]  }
  0x75   :  { %398 = vmatprep.subr.bf16.mxu1 %v1411_v28  ;;  %v1483_v28 = vld [vmem:[#allocation8 + $0x120] ss:$8 sps:$4 sm:$0xff]  }
  0x77   :  { %642 = vmatpush1.bf16.msra.mxu0 %v1450_v55 }
  0x78   :  { %399 = vmatpush1.bf16.msra.mxu1 %v1413_v29  ;;  %643 = vmatprep.subr.bf16.mxu0 %v1455_v56  ;;  %v1488_v29 = vld [vmem:[#allocation8 + $0x134] ss:$8 sps:$4 sm:$0xff]  }
  0x79   :  { %400 = vmatprep.subr.bf16.mxu1 %v1414_v30  ;;  %v1486_v30 = vld [vmem:[#allocation8 + $0x130] ss:$8 sps:$4 sm:$0xff]  }
  0x7b   :  { %644 = vmatpush1.bf16.msra.mxu0 %v1453_v57 }
  0x7c   :  { %401 = vmatpush1.bf16.msra.mxu1 %v1416_v31  ;;  %645 = vmatprep.subr.bf16.mxu0 %v1458_v58  ;;  %v1491_v31 = vld [vmem:[#allocation8 + $0x144] ss:$8 sps:$4 sm:$0xff]  }
  0x7d   :  { %402 = vmatprep.subr.bf16.mxu1 %v1417_v32  ;;  %v1489_v32 = vld [vmem:[#allocation8 + $0x140] ss:$8 sps:$4 sm:$0xff]  }
  0x7f   :  { %646 = vmatpush1.bf16.msra.mxu0 %v1456_v59 }
  0x80   :  { %403 = vmatpush1.bf16.msra.mxu1 %v1419_v33  ;;  %647 = vmatprep.subr.bf16.mxu0 %v1461_v60  ;;  %v1494_v33 = vld [vmem:[#allocation8 + $0x154] ss:$8 sps:$4 sm:$0xff]  }
  0x81   :  { %404 = vmatprep.subr.bf16.mxu1 %v1420_v34  ;;  %v1492_v34 = vld [vmem:[#allocation8 + $0x150] ss:$8 sps:$4 sm:$0xff]  }
  0x83   :  { %648 = vmatpush1.bf16.msra.mxu0 %v1459_v61 }
  0x84   :  { %405 = vmatpush1.bf16.msra.mxu1 %v1422_v35  ;;  %649 = vmatprep.subr.bf16.mxu0 %v1464_v62  ;;  %v1497_v35 = vld [vmem:[#allocation8 + $0x164] ss:$8 sps:$4 sm:$0xff]  }
  0x85   :  { %406 = vmatprep.subr.bf16.mxu1 %v1423_v36  ;;  %v1495_v36 = vld [vmem:[#allocation8 + $0x160] ss:$8 sps:$4 sm:$0xff]  }
  0x87   :  { %650 = vmatpush1.bf16.msra.mxu0 %v1462_v63 }
  0x88   :  { %407 = vmatpush1.bf16.msra.mxu1 %v1425_v37  ;;  %651 = vmatprep.subr.bf16.mxu0 %v1467_v0  ;;  %v1500_v37 = vld [vmem:[#allocation8 + $0x174] ss:$8 sps:$4 sm:$0xff]   ;;  %v1521_v0 = vld [vmem:[#allocation8 + $0x1e4] ss:$8 sps:$4 sm:$0xff]  }
  0x89   :  { %408 = vmatprep.subr.bf16.mxu1 %v1426_v38  ;;  %v1498_v38 = vld [vmem:[#allocation8 + $0x170] ss:$8 sps:$4 sm:$0xff]  }
  0x8b   :  { %652 = vmatpush1.bf16.msra.mxu0 %v1465_v1  ;;  %v1519_v1 = vld [vmem:[#allocation8 + $0x1e0] ss:$8 sps:$4 sm:$0xff]  }
  0x8c   :  { %409 = vmatpush1.bf16.msra.mxu1 %v1428_v39  ;;  %653 = vmatprep.subr.bf16.mxu0 %v1470_v2  ;;  %v1503_v39 = vld [vmem:[#allocation8 + $0x184] ss:$8 sps:$4 sm:$0xff]   ;;  %v1524_v2 = vld [vmem:[#allocation8 + $0x1f4] ss:$8 sps:$4 sm:$0xff]  }
  0x8d   :  { %880 = vmatprep.subr.bf16.mxu1 %v1479_v24  ;;  %v1548_v24 = vld [vmem:[#allocation9 + $0x174] ss:$8 sps:$4 sm:$0xff]  }
  0x8f   :  { %654 = vmatpush1.bf16.msra.mxu0 %v1468_v3  ;;  %v1522_v3 = vld [vmem:[#allocation8 + $0x1f0] ss:$8 sps:$4 sm:$0xff]  }
  0x90   :  { %655 = vmatprep.subr.bf16.mxu0 %v1473_v19  ;;  %v1537_v19 = vld [vmem:[#allocation9 + $0x140] ss:$8 sps:$4 sm:$0xff]  }
  0x93   :  { %656 = vmatpush1.bf16.msra.mxu0 %v1471_v20  ;;  %v1542_v20 = vld [vmem:[#allocation9 + $0x154] ss:$8 sps:$4 sm:$0xff]  }
  0x94   :  { %657 = vmatprep.subr.bf16.mxu0 %v1476_v21  ;;  %v1540_v21 = vld [vmem:[#allocation9 + $0x150] ss:$8 sps:$4 sm:$0xff]  }
  0x97   :  { %658 = vmatpush1.bf16.msra.mxu0 %v1474_v22  ;;  %v1545_v22 = vld [vmem:[#allocation9 + $0x164] ss:$8 sps:$4 sm:$0xff]  }
 0x129   :  { %v165_v11 = vpop.f32.mrb[0].mxu0 }
 0x12a   :  { %v1823_v12 = vadd.f32 %v165_v11, %v100_v9  ;;  %v167_v13 = vpop.f32.mrb[1].mxu0  ;;  %v1527_v9 = vld [vmem:[#allocation9 + $0x104] ss:$8 sps:$4 sm:$0xff]   ;;  %v1528_v11 = vld [vmem:[#allocation9 + $0x110] ss:$8 sps:$4 sm:$0xff]  }
 0x12b   :  { %v1825_v14 = vadd.f32 %v167_v13, %v104_v10  ;;  %v169_v15 = vpop.f32.mrb[2].mxu0  ;;  %v1530_v10 = vld [vmem:[#allocation9 + $0x114] ss:$8 sps:$4 sm:$0xff]   ;;  %1131 = vmatprep.subr.bf16.mxu0 %v1527_v9  ;;  %v1533_v13 = vld [vmem:[#allocation9 + $0x124] ss:$8 sps:$4 sm:$0xff]  }
 0x12c   :  { %v170_v16 = vpop.f32.mrb[3].mxu0  ;;  %v172_v18 = vpack.c.bf16 %v1823_v12, %v1823_v12  ;;  %v1531_v15 = vld [vmem:[#allocation9 + $0x120] ss:$8 sps:$4 sm:$0xff]  }
 0x12d   :  { %v173_v17 = vpack.c.bf16 %v1825_v14, %v1825_v14  ;;  %v1536_v16 = vld [vmem:[#allocation9 + $0x134] ss:$8 sps:$4 sm:$0xff]  }
 0x12f   :  { %410 = vmatprep.mubr.bf16.mxu1 %v173_v17  ;;  %v1534_v17 = vld [vmem:[#allocation9 + $0x130] ss:$8 sps:$4 sm:$0xff]  }
 0x130   :  { %411 = vmatmul.mubr.bf16.vlgmr.msra.gmra.mrb[0].mxu1 %v172_v18  ;;  %v1539_v18 = vld [vmem:[#allocation9 + $0x144] ss:$8 sps:$4 sm:$0xff]  }
 0x131   :  { %881 = vmatpush1.bf16.msra.mxu1 %v1477_v23  ;;  %v1543_v23 = vld [vmem:[#allocation9 + $0x160] ss:$8 sps:$4 sm:$0xff]  }
 0x132   :  { %882 = vmatprep.subr.bf16.mxu1 %v1482_v25  ;;  %v1546_v25 = vld [vmem:[#allocation9 + $0x170] ss:$8 sps:$4 sm:$0xff]  }
 0x135   :  { %883 = vmatpush1.bf16.msra.mxu1 %v1480_v26  ;;  %v1551_v26 = vld [vmem:[#allocation9 + $0x184] ss:$8 sps:$4 sm:$0xff]  }
 0x136   :  { %884 = vmatprep.subr.bf16.mxu1 %v1485_v27  ;;  %v1549_v27 = vld [vmem:[#allocation9 + $0x180] ss:$8 sps:$4 sm:$0xff]  }
 0x139   :  { %885 = vmatpush1.bf16.msra.mxu1 %v1483_v28  ;;  %v1554_v28 = vld [vmem:[#allocation9 + $0x194] ss:$8 sps:$4 sm:$0xff]  }
 0x13a   :  { %886 = vmatprep.subr.bf16.mxu1 %v1488_v29  ;;  %v1552_v29 = vld [vmem:[#allocation9 + $0x190] ss:$8 sps:$4 sm:$0xff]  }
 0x13d   :  { %887 = vmatpush1.bf16.msra.mxu1 %v1486_v30  ;;  %v1557_v30 = vld [vmem:[#allocation9 + $0x1a4] ss:$8 sps:$4 sm:$0xff]  }
 0x13e   :  { %888 = vmatprep.subr.bf16.mxu1 %v1491_v31  ;;  %v1555_v31 = vld [vmem:[#allocation9 + $0x1a0] ss:$8 sps:$4 sm:$0xff]  }
 0x141   :  { %889 = vmatpush1.bf16.msra.mxu1 %v1489_v32  ;;  %v1560_v32 = vld [vmem:[#allocation9 + $0x1b4] ss:$8 sps:$4 sm:$0xff]  }
 0x142   :  { %890 = vmatprep.subr.bf16.mxu1 %v1494_v33  ;;  %v1558_v33 = vld [vmem:[#allocation9 + $0x1b0] ss:$8 sps:$4 sm:$0xff]  }
 0x145   :  { %891 = vmatpush1.bf16.msra.mxu1 %v1492_v34  ;;  %v1563_v34 = vld [vmem:[#allocation9 + $0x1c4] ss:$8 sps:$4 sm:$0xff]  }
 0x146   :  { %892 = vmatprep.subr.bf16.mxu1 %v1497_v35  ;;  %v1561_v35 = vld [vmem:[#allocation9 + $0x1c0] ss:$8 sps:$4 sm:$0xff]  }
 0x149   :  { %893 = vmatpush1.bf16.msra.mxu1 %v1495_v36  ;;  %v1566_v36 = vld [vmem:[#allocation9 + $0x1d4] ss:$8 sps:$4 sm:$0xff]  }
 0x14a   :  { %894 = vmatprep.subr.bf16.mxu1 %v1500_v37  ;;  %v1564_v37 = vld [vmem:[#allocation9 + $0x1d0] ss:$8 sps:$4 sm:$0xff]  }
 0x14d   :  { %895 = vmatpush1.bf16.msra.mxu1 %v1498_v38  ;;  %v455_v38 = vld [vmem:[%s1879_s6] sm:$0x3] }
 0x14e   :  { %896 = vmatprep.subr.bf16.mxu1 %v1503_v39  ;;  %v460_v39 = vrot.slane %v455_v38, %v1813_v6 }
 0x151   :  { %897 = vmatpush1.bf16.msra.mxu1 %v1501_v40  ;;  %v464_v40 = vrot.slane %v455_v38, %v1819_v8 }
 0x152   :  { %898 = vmatprep.subr.bf16.mxu1 %v1506_v41 }
 0x155   :  { %899 = vmatpush1.bf16.msra.mxu1 %v1504_v42 }
 0x156   :  { %900 = vmatprep.subr.bf16.mxu1 %v1509_v43 }
 0x159   :  { %901 = vmatpush1.bf16.msra.mxu1 %v1507_v44 }
 0x15a   :  { %902 = vmatprep.subr.bf16.mxu1 %v1512_v45 }
 0x15d   :  { %903 = vmatpush1.bf16.msra.mxu1 %v1510_v46 }
 0x15e   :  { %904 = vmatprep.subr.bf16.mxu1 %v1515_v47 }
 0x161   :  { %905 = vmatpush1.bf16.msra.mxu1 %v1513_v48 }
 0x162   :  { %906 = vmatprep.subr.bf16.mxu1 %v1518_v49 }
 0x165   :  { %907 = vmatpush1.bf16.msra.mxu1 %v1516_v50 }
 0x166   :  { %908 = vmatprep.subr.bf16.mxu1 %v1521_v0 }
 0x169   :  { %909 = vmatpush1.bf16.msra.mxu1 %v1519_v1 }
 0x16a   :  { %910 = vmatprep.subr.bf16.mxu1 %v1524_v2 }
 0x16d   :  { %911 = vmatpush1.bf16.msra.mxu1 %v1522_v3 }
 0x203   :  { %v412_v54 = vpop.f32.mrb[0].mxu1 }
 0x204   :  { %v413_v55 = vadd.f32 %v412_v54, %v211_v52  ;;  %v414_v56 = vpop.f32.mrb[1].mxu1  ;;  %v1567_v54 = vld [vmem:[#allocation9 + $0x1e0] ss:$8 sps:$4 sm:$0xff]  }
 0x205   :  { %v415_v57 = vadd.f32 %v414_v56, %v215_v53  ;;  %v416_v58 = vpop.f32.mrb[2].mxu1  ;;  %v1569_v53 = vld [vmem:[#allocation9 + $0x1e4] ss:$8 sps:$4 sm:$0xff]   ;;  %v1570_v56 = vld [vmem:[#allocation9 + $0x1f0] ss:$8 sps:$4 sm:$0xff]  }
 0x206   :  { %v419_v59 = vmax.f32 %v413_v55, 0.0  ;;  %v417_v60 = vpop.f32.mrb[3].mxu1  ;;  %v1572_v55 = vld [vmem:[#allocation9 + $0x1f4] ss:$8 sps:$4 sm:$0xff]  }
 0x207   :  { %v420_v61 = vmax.f32 %v415_v57, 0.0 }
 0x208   :  { %v421_v63 = vpack.c.bf16 %v419_v59, %v419_v59 }
 0x209   :  { %v422_v62 = vpack.c.bf16 %v420_v61, %v420_v61 }
 0x20b   :  { %659 = vmatprep.mubr.bf16.mxu0 %v422_v62 }
 0x20c   :  { %660 = vmatmul.mubr.bf16.vlgmr.msra.gmra.mrb[4].mxu0 %v421_v63 }
 0x20d   :  { %1132 = vmatpush1.bf16.msra.mxu0 %v1525_v7  ;;  %v1333_v7 = vld [vmem:[%s1879_s6 + $0x2] sm:$0x3]  ;;  %s1698_s6 = smov [#allocation11]  }
 0x20e   :  { %1133 = vmatprep.subr.bf16.mxu0 %v1530_v10  ;;  %v964_v9 = vrot.slane %v1333_v7, %v1813_v6  ;;  %v968_v10 = vrot.slane %v1333_v7, %v1819_v8 }
 0x211   :  { %1134 = vmatpush1.bf16.msra.mxu0 %v1528_v11 }
 0x212   :  { %1135 = vmatprep.subr.bf16.mxu0 %v1533_v13  ;;  %v1176_v13 = vld [vmem:[%s1880_s7] sm:$0x3]  ;;  %s1220_s7 = sshll.u32 %s1698_s6, 4  ;;  %s1221_s7 = int_to_ptr.vmem [resolvable:$true] %s1220_s7 }
 0x213   :  { %s1661_s23 = scalar_lea.vmem %s1221_s7, 16  ;;  %s1665_s24 = scalar_lea.vmem %s1221_s7, 32 }
 0x214   :  { %p1662_p4 = scmp.ne.s32.totalorder %s1221_s7, %s1661_s23  ;;  %p1666_p5 = scmp.lt.s32.totalorder %s1221_s7, %s1221_s7 }
 0x215   :  { %1136 = vmatpush1.bf16.msra.mxu0 %v1531_v15  ;;  %p1667_p6 = scmp.lt.s32.totalorder %s1665_s24, %s1661_s23 }
 0x216   :  { %1137 = vmatprep.subr.bf16.mxu0 %v1536_v16 }
 0x217   :  { %p1668_p7 = por %p1667_p6, %p1666_p5 }
 0x219   :  { %1138 = vmatpush1.bf16.msra.mxu0 %v1534_v17  ;;  %p1669_p8 = pnand %p1668_p7, %p1662_p4 }
 0x21a   :  { %1139 = vmatprep.subr.bf16.mxu0 %v1539_v18 }
 0x21d   :  { %1140 = vmatpush1.bf16.msra.mxu0 %v1537_v19 }
 0x21e   :  { %1141 = vmatprep.subr.bf16.mxu0 %v1542_v20 }
 0x221   :  { %1142 = vmatpush1.bf16.msra.mxu0 %v1540_v21  ;;  %v1181_v21 = vrot.slane %v1176_v13, %v1813_v6 }
 0x222   :  { %1143 = vmatprep.subr.bf16.mxu0 %v1545_v22 }
 0x225   :  { %1144 = vmatpush1.bf16.msra.mxu0 %v1543_v23  ;;  %v1185_v23 = vrot.slane %v1176_v13, %v1819_v8 }
 0x226   :  { %1145 = vmatprep.subr.bf16.mxu0 %v1548_v24 }
 0x229   :  { %1146 = vmatpush1.bf16.msra.mxu0 %v1546_v25 }
 0x22a   :  { %1147 = vmatprep.subr.bf16.mxu0 %v1551_v26 }
 0x22d   :  { %1148 = vmatpush1.bf16.msra.mxu0 %v1549_v27 }
 0x22e   :  { %1149 = vmatprep.subr.bf16.mxu0 %v1554_v28 }
 0x231   :  { %1150 = vmatpush1.bf16.msra.mxu0 %v1552_v29  ;;  %v1193_v29 = vld [vmem:[#allocation2] sm:$0x1] }
 0x232   :  { %1151 = vmatprep.subr.bf16.mxu0 %v1557_v30 }
 0x235   :  { %1152 = vmatpush1.bf16.msra.mxu0 %v1555_v31  ;;  %v1206_v31 = vand.u32 127, %v97_v4 }
 0x236   :  { %1153 = vmatprep.subr.bf16.mxu0 %v1560_v32 }
 0x239   :  { %1154 = vmatpush1.bf16.msra.mxu0 %v1558_v33  ;;  %v1209_v33 = vsub.s32 %v1206_v31, %v1810_v5 }
 0x23a   :  { %1155 = vmatprep.subr.bf16.mxu0 %v1563_v34 }
 0x23d   :  { %1156 = vmatpush1.bf16.msra.mxu0 %v1561_v35 }
 0x23e   :  { %1157 = vmatprep.subr.bf16.mxu0 %v1566_v36 }
 0x241   :  { %1158 = vmatpush1.bf16.msra.mxu0 %v1564_v37 }
 0x242   :  { %1159 = vmatprep.subr.bf16.mxu0 %v1569_v53 }
 0x245   :  { %1160 = vmatpush1.bf16.msra.mxu0 %v1567_v54 }
 0x246   :  { %1161 = vmatprep.subr.bf16.mxu0 %v1572_v55 }
 0x249   :  { %1162 = vmatpush1.bf16.msra.mxu0 %v1570_v56 }
 0x2df   :  { %v661_v41 = vpop.f32.mrb[4].mxu0 }
 0x2e0   :  { %v662_v42 = vadd.f32 %v661_v41, %v460_v39  ;;  %v663_v43 = vpop.f32.mrb[5].mxu0 }
 0x2e1   :  { %v664_v44 = vadd.f32 %v663_v43, %v464_v40  ;;  %v665_v45 = vpop.f32.mrb[6].mxu0 }
 0x2e2   :  { %v668_v46 = vadd.f32 %v662_v42, %v1823_v12  ;;  %v666_v47 = vpop.f32.mrb[7].mxu0  ;;  %v1300_v12 = vld [vmem:[%s1877_s4 + $0x2] sm:$0x3] }
 0x2e3   :  { %v669_v48 = vadd.f32 %v664_v44, %v1825_v14  ;;  %v713_v14 = vrot.slane %v1300_v12, %v1813_v6  ;;  %v717_v57 = vrot.slane %v1300_v12, %v1819_v8 }
 0x2e4   :  { %v670_v49 = vmax.f32 %v668_v46, 0.0 }
 0x2e5   :  { %v671_v50 = vmax.f32 %v669_v48, 0.0 }
 0x2e6   :  { %v672_v52 = vpack.c.bf16 %v670_v49, %v670_v49 }
 0x2e7   :  { %v673_v51 = vpack.c.bf16 %v671_v50, %v671_v50 }
 0x2e9   :  { %912 = vmatprep.mubr.bf16.mxu1 %v673_v51 }
 0x2ea   :  { %913 = vmatmul.mubr.bf16.vlgmr.msra.gmra.mrb[4].mxu1 %v672_v52 }
 0x3bd   :  { %v914_v58 = vpop.f32.mrb[4].mxu1 }
 0x3be   :  { %v915_v59 = vadd.f32 %v914_v58, %v713_v14  ;;  %v916_v60 = vpop.f32.mrb[5].mxu1 }
 0x3bf   :  { %v917_v61 = vadd.f32 %v916_v60, %v717_v57  ;;  %v918_v62 = vpop.f32.mrb[6].mxu1 }
 0x3c0   :  { %v921_v63 = vmax.f32 %v915_v59, 0.0  ;;  %v919_v0 = vpop.f32.mrb[7].mxu1 }
 0x3c1   :  { %v922_v1 = vmax.f32 %v917_v61, 0.0 }
 0x3c2   :  { %v923_v3 = vpack.c.bf16 %v921_v63, %v921_v63 }
 0x3c3   :  { %v924_v2 = vpack.c.bf16 %v922_v1, %v922_v1 }
 0x3c5   :  { %1163 = vmatprep.mubr.bf16.mxu0 %v924_v2 }
 0x3c6   :  { %1164 = vmatmul.mubr.bf16.vlgmr.msra.gmra.mrb[8].mxu0 %v923_v3 }
 0x499   :  { %v1165_v11 = vpop.f32.mrb[8].mxu0 }
 0x49a   :  { %v1166_v15 = vadd.f32 %v1165_v11, %v964_v9  ;;  %v1167_v16 = vpop.f32.mrb[9].mxu0 }
 0x49b   :  { %v1168_v17 = vadd.f32 %v1167_v16, %v968_v10  ;;  %v1169_v18 = vpop.f32.mrb[10].mxu0 }
 0x49c   :  { %v1172_v19 = vadd.f32 %v1166_v15, %v670_v49  ;;  %v1170_v20 = vpop.f32.mrb[11].mxu0 }
 0x49d   :  { %v1173_v22 = vadd.f32 %v1168_v17, %v671_v50 }
 0x49e   :  { %v1174_v24 = vmax.f32 %v1172_v19, 0.0 }
 0x49f   :  { %v1175_v25 = vmax.f32 %v1173_v22, 0.0 }
 0x4a0   :  { %v1188_v26 = vmul.f32 %v1181_v21, %v1174_v24 }
 0x4a1   :  { %v1189_v27 = vmul.f32 %v1185_v23, %v1175_v25 }
 0x4a3   :  { %v1190_v28 = vadd.f32 %v1189_v27, %v1188_v26 }
 0x4a5   :  { %1191 = vadd.xlane.f32.xlu0 %v1190_v28 }
 0x4bb   :  { %1196 = vperm.xlu0 %1374, %v1193_v29  }
 0x532   :  { %v1192_v30 = vpop.xlane.xlu0 %1191 }
 0x53a   :  { %v1197_v32 = vpop.permute.xlu0 %1196 }
 0x53b   :  { %v1202_v34 = vrot.slane %v1197_v32, %v1813_v6 }
 0x53d   :  { %v1203_v35 = vadd.f32 %v1202_v34, %v1192_v30 }
 0x53f   :  { %v1210_v8 = vrot.slane %v1203_v35, %v1209_v33 }
 0x541   :  { %1213 = vst.msk [vmem:[#allocation11] sm:$0x1] %vm1212_vm1, %v1210_v8 }
 0x542   :  { %1672 = shalt.err (!%p1669_p8)
}
 0x543   :  { %s1673_s26 = scalar_lea.hbm %s1882_s9, 16 }
 0x544   :  { %p1674_p9 = scmp.ne.s32.totalorder %s1882_s9, %s1673_s26  ;;  %p1677_p10 = scmp.lt.u32.totalorder %s1673_s26, %s1882_s9 }
 0x546   :  { %p1679_p11 = pnand %p1677_p10, %p1674_p9 }
 0x548   :  { %1682 = shalt.err (!%p1679_p11)
}
 0x549   :  { %1223 = dma.vmem_to_hbm [thread:$0]  %s1221_s7, 16, %s1882_s9, [#allocation5]  }
 0x54a   :  { %1689 = dma.done.wait [#allocation5], 16  }
 0x54b   :  { %1690 = vsyncadd [#allocation5], 4294967280 }
 0x54c   :  { %1227 = vsyncpa [#allocation4], 1 }
 0x54d   :  { %1228 = vsyncpa [#allocation7], 1 }
 0x54e   :  { %1229 = vsyncpa [#allocation10], 1 }
 0x54f   :  { %1230 = vsyncpa [#allocation5], 1 }

</bundles_post_ra>
